<compile_context>
chip_gen: v6e
topology: v6e:2x2x1
jax: 0.10.0
libtpu: 0.0.40
codegen_flags: <defaults>
</compile_context>

<pallas_src>
import functools
import math

import jax
import jax.numpy as jnp
from jax.experimental import pallas as pl
from jax.experimental.pallas import tpu as pltpu


def _conv_relu_kernel(x_ref, w_ref, b_ref, o_ref, *, KH, KW):
    # x_ref: (Hp, Wp, Cin)      resident padded image (this batch element)
    # w_ref: (KH*KW, Cin, Cb)   resident weight tile (Cb lane-dense, >= 128)
    # b_ref: (1, Cb)            bias tile (f32)
    # o_ref: (TH, Wo, Cb)       output strip
    TH, Wo, Cb = o_ref.shape
    Cin = x_ref.shape[-1]

    # First padded-input row needed by this output strip.
    h0 = pl.multiple_of(pl.program_id(1) * TH, TH)

    acc = jnp.zeros((TH * Wo, Cb), jnp.float32)
    for kh in range(KH):
        for kw in range(KW):
            # Direct ref slice: dynamic row offset (halo handled here), static
            # kw column offset.  No whole-slab load, no im2col patch buffer.
            tap = x_ref[pl.ds(h0 + kh, TH), kw:kw + Wo, :]        # (TH, Wo, Cin)
            acc += jnp.dot(tap.reshape(TH * Wo, Cin),
                           w_ref[kh * KW + kw],
                           preferred_element_type=jnp.float32)

    acc = jnp.maximum(acc + b_ref[...].astype(jnp.float32), 0.0)  # bias + ReLU
    o_ref[...] = acc.reshape(TH, Wo, Cb).astype(o_ref.dtype)


def _round_up(x, m):
    return ((x + m - 1) // m) * m


def _vmem_bytes(shape, dtype):
    """VMEM footprint of one block, accounting for (8,128) tiling of the last 2 dims."""
    shape = tuple(int(s) for s in shape)
    if len(shape) < 2:
        shape = (1,) * (2 - len(shape)) + shape
    *lead, s, l = shape
    lead = math.prod(lead) if lead else 1
    return lead * _round_up(s, 8) * _round_up(l, 128) * jnp.dtype(dtype).itemsize


def _largest_divisor_leq(n, cap):
    cap = max(1, min(int(cap), n))
    for d in range(cap, 0, -1):
        if n % d == 0:
            return d
    return 1


def conv_relu(x_nchw, weight_oihw, bias, *, compute_dtype=None,
              h_block=None, cout_block=None):
    """nn.Conv2d(Cin, Cout, kernel_size, padding=1) -> ReLU.  NCHW in / NCHW out."""
    N, Cin, H, W = x_nchw.shape
    Cout, Cin_w, KH, KW = weight_oihw.shape
    assert Cin_w == Cin
    PAD = 1                                   # the module hard-codes padding=1
    Ho = H + 2 * PAD - KH + 1
    Wo = W + 2 * PAD - KW + 1
    Hp, Wp = H + 2 * PAD, W + 2 * PAD
    assert Ho >= 1 and Wo >= 1

    # ---- activations: NCHW -> NHWC + halo pad (wrapper-side; the module's
    # interface is NCHW so the layout conversion sits at the boundary).
    # TODO(synk): keep activations NHWC end-to-end upstream and fold the halo
    # pad into the kernel (masked edge rows) to drop these extra HBM passes.
    x_nhwc = jnp.transpose(x_nchw, (0, 2, 3, 1))
    x_pad = jnp.pad(x_nhwc, ((0, 0), (PAD, PAD), (PAD, PAD), (0, 0)))

    # ---- weights: OIHW -> (KH*KW, Cin, Cout), Cout zero-padded lane-dense.
    Cpad = max(128, _round_up(Cout, 128))
    w3d = jnp.transpose(weight_oihw, (2, 3, 1, 0)).reshape(KH * KW, Cin, Cout)
    w3d = jnp.pad(w3d, ((0, 0), (0, 0), (0, Cpad - Cout)))
    b2d = jnp.pad(bias.astype(jnp.float32), (0, Cpad - Cout)).reshape(1, Cpad)

    if compute_dtype is not None:
        x_pad = x_pad.astype(compute_dtype)
        w3d = w3d.astype(compute_dtype)

    # ---- cout tiling: keep the (tiny) weight resident unless Cpad is large.
    if cout_block is None:
        if Cpad <= 512:
            cout_block = Cpad
        elif Cpad % 256 == 0:
            cout_block = 256
        else:
            cout_block = 128
    assert Cpad % cout_block == 0

    # ---- H-strip tiling: TH output rows per step (TH | Ho); M = TH*Wo rows
    # per MXU dot.  Larger strips amortize the ~0.35us/step overhead, smaller
    # strips bound the accumulator and give the grid enough parallel points.
    if h_block is None:
        h_block = max(1, 512 // max(Wo, 1))
    TH = _largest_divisor_leq(Ho, h_block)
    n_strips = Ho // TH

    grid = (N, n_strips, Cpad // cout_block)
    kernel = functools.partial(_conv_relu_kernel, KH=KH, KW=KW)

    # ---- scoped-VMEM budget from padded-lane block footprints (+ headroom).
    cdt = x_pad.dtype
    x_blk = _vmem_bytes((Hp, Wp, Cin), cdt)
    o_blk = _vmem_bytes((TH, Wo, cout_block), x_nchw.dtype)
    w_blk = _vmem_bytes((KH * KW, Cin, cout_block), cdt)
    b_blk = _vmem_bytes((1, cout_block), jnp.float32)
    acc_blk = _vmem_bytes((TH * Wo, cout_block), jnp.float32)
    need = 2 * (x_blk + o_blk + w_blk + b_blk) + 3 * acc_blk + (4 << 20)
    try:
        vmem_cap = int(pltpu.get_tpu_info().vmem_capacity_bytes)
    except Exception:
        vmem_cap = 64 << 20                   # v7x floor; v5e/v6e have 128 MiB
    vmem_limit = int(min(int(0.9 * vmem_cap), max(need, 32 << 20)))

    # TODO(synk): for very large feature maps the resident padded image should
    # become manually DMA'd halo strips (memory_space=pl.ANY + double buffer)
    # so the per-step VMEM footprint stays bounded on v7x (64 MiB).
    out_pad = pl.pallas_call(
        kernel,
        out_shape=jax.ShapeDtypeStruct((N, Ho, Wo, Cpad), x_nchw.dtype),
        grid_spec=pltpu.PrefetchScalarGridSpec(
            num_scalar_prefetch=0,
            grid=grid,
            in_specs=[
                # Padded image: constant block index along strip/cout axes ->
                # resident in VMEM, re-DMA'd only when the batch index changes.
                pl.BlockSpec((None, Hp, Wp, Cin), lambda n, h, c: (n, 0, 0, 0)),
                # Weight / bias: resident (only the cout axis, usually extent
                # 1, can change their block index).
                pl.BlockSpec((KH * KW, Cin, cout_block), lambda n, h, c: (0, 0, c)),
                pl.BlockSpec((1, cout_block), lambda n, h, c: (0, c)),
            ],
            out_specs=pl.BlockSpec((None, TH, Wo, cout_block),
                                   lambda n, h, c: (n, h, 0, c)),
        ),
        compiler_params=pltpu.CompilerParams(
            dimension_semantics=("parallel", "parallel", "arbitrary"),
            vmem_limit_bytes=vmem_limit),
    )(x_pad, w3d, b2d)

    # Drop channel padding, NHWC -> NCHW to match the PyTorch convention.
    return jnp.transpose(out_pad[..., :Cout], (0, 3, 1, 2))


conv_relu_jit = jax.jit(
    conv_relu, static_argnames=("compute_dtype", "h_block", "cout_block"))


if __name__ == "__main__":
    key = jax.random.PRNGKey(0)
    kx, kw, kb = jax.random.split(key, 3)

    N, Cin, Cout, H, W, K = 2, 4, 8, 16, 16, 3

    x = jax.random.normal(kx, (N, Cin, H, W), dtype=jnp.float32)
    # Deterministic init mimicking nn.Conv2d default (uniform +/- 1/sqrt(fan_in)).
    fan_in = Cin * K * K
    bound = 1.0 / (fan_in ** 0.5)
    weight = jax.random.uniform(kw, (Cout, Cin, K, K), jnp.float32, -bound, bound)
    bias = jax.random.uniform(kb, (Cout,), jnp.float32, -bound, bound)

    # f32 path (matches the PyTorch module's numerics); h_block=8 -> 2 strips
    # per image so the strip axis is exercised (grid = (2, 2, 1)).
    out = jax.block_until_ready(conv_relu_jit(x, weight, bias, h_block=8))

    # Reference: XLA conv + ReLU (same semantics as torch Conv2d(pad=1)+ReLU).
    ref = jax.lax.conv_general_dilated(
        x, weight, window_strides=(1, 1), padding=((1, 1), (1, 1)),
        dimension_numbers=("NCHW", "OIHW", "NCHW"))
    ref = jnp.maximum(ref + bias.reshape(1, Cout, 1, 1), 0.0)

    assert out.shape == (N, Cout, H, W)
    assert jnp.allclose(out, ref, atol=1e-3, rtol=1e-3), \
        float(jnp.max(jnp.abs(out - ref)))

    # bf16 operand path (v5e/v6e/v7x bf16 MXU rate, f32 accumulation) — looser tol.
    out_bf16 = jax.block_until_ready(
        conv_relu_jit(x, weight, bias, compute_dtype=jnp.bfloat16, h_block=8))
    assert jnp.allclose(out_bf16, ref, atol=1e-1, rtol=1e-1)

    print("KERNEL_OK")
</pallas_src>

<mosaic_0001>
module attributes {stable_mosaic.version = 11 : i64} {
  func.func @_conv_relu_kernel(%arg0: i32, %arg1: i32, %arg2: i32, %arg3: memref<1x18x18x4xf32, #tpu.memory_space<vmem>>, %arg4: memref<9x4x128xf32, #tpu.memory_space<vmem>>, %arg5: memref<1x128xf32, #tpu.memory_space<vmem>>, %arg6: memref<1x8x16x128xf32, #tpu.memory_space<vmem>>) attributes {dimension_semantics = [#tpu.dimension_semantics<parallel>, #tpu.dimension_semantics<parallel>, #tpu.dimension_semantics<arbitrary>], iteration_bounds = array<i64: 2, 2, 1>, scalar_prefetch = 0 : i64, scratch_operands = 0 : i64, tpu.core_type = #tpu.core_type<tc>, window_params = [{transform_indices = @transform_0, window_bounds = array<i64: 1, 18, 18, 4>}, {transform_indices = @transform_1, window_bounds = array<i64: 9, 4, 128>}, {transform_indices = @transform_2, window_bounds = array<i64: 1, 128>}, {transform_indices = @transform_3, window_bounds = array<i64: 1, 8, 16, 128>}]} {
    %c8_i32 = arith.constant 8 : i32
    %0 = arith.muli %arg1, %c8_i32 : i32
    %1 = tpu.assume_multiple %0, 8 : i32
    %cst = arith.constant 0.000000e+00 : f32
    %2 = vector.broadcast %cst : f32 to vector<128x128xf32>
    %c0_i32 = arith.constant 0 : i32
    %3 = arith.addi %1, %c0_i32 : i32
    %c0 = arith.constant 0 : index
    %4 = arith.index_cast %3 : i32 to index
    %c0_0 = arith.constant 0 : index
    %c0_1 = arith.constant 0 : index
    %5 = vector.load %arg3[%c0, %4, %c0_0, %c0_1] : memref<1x18x18x4xf32, #tpu.memory_space<vmem>>, vector<1x8x16x4xf32>
    %6 = vector.shape_cast %5 : vector<1x8x16x4xf32> to vector<8x16x4xf32>
    %7 = vector.shape_cast %6 : vector<8x16x4xf32> to vector<128x4xf32>
    %c0_2 = arith.constant 0 : index
    %c0_3 = arith.constant 0 : index
    %c0_4 = arith.constant 0 : index
    %8 = vector.load %arg4[%c0_2, %c0_3, %c0_4] : memref<9x4x128xf32, #tpu.memory_space<vmem>>, vector<1x4x128xf32>
    %9 = vector.shape_cast %8 : vector<1x4x128xf32> to vector<4x128xf32>
    %cst_5 = arith.constant dense<0.000000e+00> : vector<128x128xf32>
    %10 = tpu.matmul %7, %9, %cst_5 {dimension_numbers = #tpu.dot_dimension_numbers<[1], [0], [0], [1], [0, 0, 1, 1], [], []>} : vector<128x4xf32>, vector<4x128xf32>, vector<128x128xf32> -> vector<128x128xf32>
    %11 = arith.addf %2, %10 : vector<128x128xf32>
    %c0_i32_6 = arith.constant 0 : i32
    %12 = arith.addi %1, %c0_i32_6 : i32
    %c0_7 = arith.constant 0 : index
    %13 = arith.index_cast %12 : i32 to index
    %c1 = arith.constant 1 : index
    %c0_8 = arith.constant 0 : index
    %14 = vector.load %arg3[%c0_7, %13, %c1, %c0_8] : memref<1x18x18x4xf32, #tpu.memory_space<vmem>>, vector<1x8x16x4xf32>
    %15 = vector.shape_cast %14 : vector<1x8x16x4xf32> to vector<8x16x4xf32>
    %16 = vector.shape_cast %15 : vector<8x16x4xf32> to vector<128x4xf32>
    %c1_9 = arith.constant 1 : index
    %c0_10 = arith.constant 0 : index
    %c0_11 = arith.constant 0 : index
    %17 = vector.load %arg4[%c1_9, %c0_10, %c0_11] : memref<9x4x128xf32, #tpu.memory_space<vmem>>, vector<1x4x128xf32>
    %18 = vector.shape_cast %17 : vector<1x4x128xf32> to vector<4x128xf32>
    %cst_12 = arith.constant dense<0.000000e+00> : vector<128x128xf32>
    %19 = tpu.matmul %16, %18, %cst_12 {dimension_numbers = #tpu.dot_dimension_numbers<[1], [0], [0], [1], [0, 0, 1, 1], [], []>} : vector<128x4xf32>, vector<4x128xf32>, vector<128x128xf32> -> vector<128x128xf32>
    %20 = arith.addf %11, %19 : vector<128x128xf32>
    %c0_i32_13 = arith.constant 0 : i32
    %21 = arith.addi %1, %c0_i32_13 : i32
    %c0_14 = arith.constant 0 : index
    %22 = arith.index_cast %21 : i32 to index
    %c2 = arith.constant 2 : index
    %c0_15 = arith.constant 0 : index
    %23 = vector.load %arg3[%c0_14, %22, %c2, %c0_15] : memref<1x18x18x4xf32, #tpu.memory_space<vmem>>, vector<1x8x16x4xf32>
    %24 = vector.shape_cast %23 : vector<1x8x16x4xf32> to vector<8x16x4xf32>
    %25 = vector.shape_cast %24 : vector<8x16x4xf32> to vector<128x4xf32>
    %c2_16 = arith.constant 2 : index
    %c0_17 = arith.constant 0 : index
    %c0_18 = arith.constant 0 : index
    %26 = vector.load %arg4[%c2_16, %c0_17, %c0_18] : memref<9x4x128xf32, #tpu.memory_space<vmem>>, vector<1x4x128xf32>
    %27 = vector.shape_cast %26 : vector<1x4x128xf32> to vector<4x128xf32>
    %cst_19 = arith.constant dense<0.000000e+00> : vector<128x128xf32>
    %28 = tpu.matmul %25, %27, %cst_19 {dimension_numbers = #tpu.dot_dimension_numbers<[1], [0], [0], [1], [0, 0, 1, 1], [], []>} : vector<128x4xf32>, vector<4x128xf32>, vector<128x128xf32> -> vector<128x128xf32>
    %29 = arith.addf %20, %28 : vector<128x128xf32>
    %c1_i32 = arith.constant 1 : i32
    %30 = arith.addi %1, %c1_i32 : i32
    %c0_20 = arith.constant 0 : index
    %31 = arith.index_cast %30 : i32 to index
    %c0_21 = arith.constant 0 : index
    %c0_22 = arith.constant 0 : index
    %32 = vector.load %arg3[%c0_20, %31, %c0_21, %c0_22] : memref<1x18x18x4xf32, #tpu.memory_space<vmem>>, vector<1x8x16x4xf32>
    %33 = vector.shape_cast %32 : vector<1x8x16x4xf32> to vector<8x16x4xf32>
    %34 = vector.shape_cast %33 : vector<8x16x4xf32> to vector<128x4xf32>
    %c3 = arith.constant 3 : index
    %c0_23 = arith.constant 0 : index
    %c0_24 = arith.constant 0 : index
    %35 = vector.load %arg4[%c3, %c0_23, %c0_24] : memref<9x4x128xf32, #tpu.memory_space<vmem>>, vector<1x4x128xf32>
    %36 = vector.shape_cast %35 : vector<1x4x128xf32> to vector<4x128xf32>
    %cst_25 = arith.constant dense<0.000000e+00> : vector<128x128xf32>
    %37 = tpu.matmul %34, %36, %cst_25 {dimension_numbers = #tpu.dot_dimension_numbers<[1], [0], [0], [1], [0, 0, 1, 1], [], []>} : vector<128x4xf32>, vector<4x128xf32>, vector<128x128xf32> -> vector<128x128xf32>
    %38 = arith.addf %29, %37 : vector<128x128xf32>
    %c1_i32_26 = arith.constant 1 : i32
    %39 = arith.addi %1, %c1_i32_26 : i32
    %c0_27 = arith.constant 0 : index
    %40 = arith.index_cast %39 : i32 to index
    %c1_28 = arith.constant 1 : index
    %c0_29 = arith.constant 0 : index
    %41 = vector.load %arg3[%c0_27, %40, %c1_28, %c0_29] : memref<1x18x18x4xf32, #tpu.memory_space<vmem>>, vector<1x8x16x4xf32>
    %42 = vector.shape_cast %41 : vector<1x8x16x4xf32> to vector<8x16x4xf32>
    %43 = vector.shape_cast %42 : vector<8x16x4xf32> to vector<128x4xf32>
    %c4 = arith.constant 4 : index
    %c0_30 = arith.constant 0 : index
    %c0_31 = arith.constant 0 : index
    %44 = vector.load %arg4[%c4, %c0_30, %c0_31] : memref<9x4x128xf32, #tpu.memory_space<vmem>>, vector<1x4x128xf32>
    %45 = vector.shape_cast %44 : vector<1x4x128xf32> to vector<4x128xf32>
    %cst_32 = arith.constant dense<0.000000e+00> : vector<128x128xf32>
    %46 = tpu.matmul %43, %45, %cst_32 {dimension_numbers = #tpu.dot_dimension_numbers<[1], [0], [0], [1], [0, 0, 1, 1], [], []>} : vector<128x4xf32>, vector<4x128xf32>, vector<128x128xf32> -> vector<128x128xf32>
    %47 = arith.addf %38, %46 : vector<128x128xf32>
    %c1_i32_33 = arith.constant 1 : i32
    %48 = arith.addi %1, %c1_i32_33 : i32
    %c0_34 = arith.constant 0 : index
    %49 = arith.index_cast %48 : i32 to index
    %c2_35 = arith.constant 2 : index
    %c0_36 = arith.constant 0 : index
    %50 = vector.load %arg3[%c0_34, %49, %c2_35, %c0_36] : memref<1x18x18x4xf32, #tpu.memory_space<vmem>>, vector<1x8x16x4xf32>
    %51 = vector.shape_cast %50 : vector<1x8x16x4xf32> to vector<8x16x4xf32>
    %52 = vector.shape_cast %51 : vector<8x16x4xf32> to vector<128x4xf32>
    %c5 = arith.constant 5 : index
    %c0_37 = arith.constant 0 : index
    %c0_38 = arith.constant 0 : index
    %53 = vector.load %arg4[%c5, %c0_37, %c0_38] : memref<9x4x128xf32, #tpu.memory_space<vmem>>, vector<1x4x128xf32>
    %54 = vector.shape_cast %53 : vector<1x4x128xf32> to vector<4x128xf32>
    %cst_39 = arith.constant dense<0.000000e+00> : vector<128x128xf32>
    %55 = tpu.matmul %52, %54, %cst_39 {dimension_numbers = #tpu.dot_dimension_numbers<[1], [0], [0], [1], [0, 0, 1, 1], [], []>} : vector<128x4xf32>, vector<4x128xf32>, vector<128x128xf32> -> vector<128x128xf32>
    %56 = arith.addf %47, %55 : vector<128x128xf32>
    %c2_i32 = arith.constant 2 : i32
    %57 = arith.addi %1, %c2_i32 : i32
    %c0_40 = arith.constant 0 : index
    %58 = arith.index_cast %57 : i32 to index
    %c0_41 = arith.constant 0 : index
    %c0_42 = arith.constant 0 : index
    %59 = vector.load %arg3[%c0_40, %58, %c0_41, %c0_42] : memref<1x18x18x4xf32, #tpu.memory_space<vmem>>, vector<1x8x16x4xf32>
    %60 = vector.shape_cast %59 : vector<1x8x16x4xf32> to vector<8x16x4xf32>
    %61 = vector.shape_cast %60 : vector<8x16x4xf32> to vector<128x4xf32>
    %c6 = arith.constant 6 : index
    %c0_43 = arith.constant 0 : index
    %c0_44 = arith.constant 0 : index
    %62 = vector.load %arg4[%c6, %c0_43, %c0_44] : memref<9x4x128xf32, #tpu.memory_space<vmem>>, vector<1x4x128xf32>
    %63 = vector.shape_cast %62 : vector<1x4x128xf32> to vector<4x128xf32>
    %cst_45 = arith.constant dense<0.000000e+00> : vector<128x128xf32>
    %64 = tpu.matmul %61, %63, %cst_45 {dimension_numbers = #tpu.dot_dimension_numbers<[1], [0], [0], [1], [0, 0, 1, 1], [], []>} : vector<128x4xf32>, vector<4x128xf32>, vector<128x128xf32> -> vector<128x128xf32>
    %65 = arith.addf %56, %64 : vector<128x128xf32>
    %c2_i32_46 = arith.constant 2 : i32
    %66 = arith.addi %1, %c2_i32_46 : i32
    %c0_47 = arith.constant 0 : index
    %67 = arith.index_cast %66 : i32 to index
    %c1_48 = arith.constant 1 : index
    %c0_49 = arith.constant 0 : index
    %68 = vector.load %arg3[%c0_47, %67, %c1_48, %c0_49] : memref<1x18x18x4xf32, #tpu.memory_space<vmem>>, vector<1x8x16x4xf32>
    %69 = vector.shape_cast %68 : vector<1x8x16x4xf32> to vector<8x16x4xf32>
    %70 = vector.shape_cast %69 : vector<8x16x4xf32> to vector<128x4xf32>
    %c7 = arith.constant 7 : index
    %c0_50 = arith.constant 0 : index
    %c0_51 = arith.constant 0 : index
    %71 = vector.load %arg4[%c7, %c0_50, %c0_51] : memref<9x4x128xf32, #tpu.memory_space<vmem>>, vector<1x4x128xf32>
    %72 = vector.shape_cast %71 : vector<1x4x128xf32> to vector<4x128xf32>
    %cst_52 = arith.constant dense<0.000000e+00> : vector<128x128xf32>
    %73 = tpu.matmul %70, %72, %cst_52 {dimension_numbers = #tpu.dot_dimension_numbers<[1], [0], [0], [1], [0, 0, 1, 1], [], []>} : vector<128x4xf32>, vector<4x128xf32>, vector<128x128xf32> -> vector<128x128xf32>
    %74 = arith.addf %65, %73 : vector<128x128xf32>
    %c2_i32_53 = arith.constant 2 : i32
    %75 = arith.addi %1, %c2_i32_53 : i32
    %c0_54 = arith.constant 0 : index
    %76 = arith.index_cast %75 : i32 to index
    %c2_55 = arith.constant 2 : index
    %c0_56 = arith.constant 0 : index
    %77 = vector.load %arg3[%c0_54, %76, %c2_55, %c0_56] : memref<1x18x18x4xf32, #tpu.memory_space<vmem>>, vector<1x8x16x4xf32>
    %78 = vector.shape_cast %77 : vector<1x8x16x4xf32> to vector<8x16x4xf32>
    %79 = vector.shape_cast %78 : vector<8x16x4xf32> to vector<128x4xf32>
    %c8 = arith.constant 8 : index
    %c0_57 = arith.constant 0 : index
    %c0_58 = arith.constant 0 : index
    %80 = vector.load %arg4[%c8, %c0_57, %c0_58] : memref<9x4x128xf32, #tpu.memory_space<vmem>>, vector<1x4x128xf32>
    %81 = vector.shape_cast %80 : vector<1x4x128xf32> to vector<4x128xf32>
    %cst_59 = arith.constant dense<0.000000e+00> : vector<128x128xf32>
    %82 = tpu.matmul %79, %81, %cst_59 {dimension_numbers = #tpu.dot_dimension_numbers<[1], [0], [0], [1], [0, 0, 1, 1], [], []>} : vector<128x4xf32>, vector<4x128xf32>, vector<128x128xf32> -> vector<128x128xf32>
    %83 = arith.addf %74, %82 : vector<128x128xf32>
    %c0_60 = arith.constant 0 : index
    %c0_61 = arith.constant 0 : index
    %84 = vector.load %arg5[%c0_60, %c0_61] : memref<1x128xf32, #tpu.memory_space<vmem>>, vector<1x128xf32>
    %85 = vector.broadcast %84 : vector<1x128xf32> to vector<128x128xf32>
    %86 = arith.addf %83, %85 : vector<128x128xf32>
    %cst_62 = arith.constant 0.000000e+00 : f32
    %87 = vector.broadcast %cst_62 : f32 to vector<128x128xf32>
    %88 = arith.maximumf %86, %87 : vector<128x128xf32>
    %89 = vector.shape_cast %88 : vector<128x128xf32> to vector<8x16x128xf32>
    %c0_63 = arith.constant 0 : index
    %c0_64 = arith.constant 0 : index
    %c0_65 = arith.constant 0 : index
    %c0_66 = arith.constant 0 : index
    %90 = vector.load %arg6[%c0_63, %c0_64, %c0_65, %c0_66] : memref<1x8x16x128xf32, #tpu.memory_space<vmem>>, vector<1x8x16x128xf32>
    %91 = vector.shape_cast %90 : vector<1x8x16x128xf32> to vector<8x16x128xf32>
    %92 = vector.shape_cast %89 : vector<8x16x128xf32> to vector<1x8x16x128xf32>
    tpu.vector_store %arg6[%c0_63, %c0_64, %c0_65, %c0_66], %92 {strides = array<i32>} : memref<1x8x16x128xf32, #tpu.memory_space<vmem>>, vector<1x8x16x128xf32>,
    return
  }
  func.func @transform_0(%arg0: i32, %arg1: i32, %arg2: i32) -> (i32, i32, i32, i32) {
    %c0_i32 = arith.constant 0 : i32
    %c0_i32_0 = arith.constant 0 : i32
    %c0_i32_1 = arith.constant 0 : i32
    %c0_i32_2 = arith.constant 0 : i32
    return %arg0, %c0_i32, %c0_i32_0, %c0_i32_1 : i32, i32, i32, i32
  }
  func.func @transform_1(%arg0: i32, %arg1: i32, %arg2: i32) -> (i32, i32, i32) {
    %c0_i32 = arith.constant 0 : i32
    %c0_i32_0 = arith.constant 0 : i32
    %c0_i32_1 = arith.constant 0 : i32
    return %c0_i32, %c0_i32_0, %arg2 : i32, i32, i32
  }
  func.func @transform_2(%arg0: i32, %arg1: i32, %arg2: i32) -> (i32, i32) {
    %c0_i32 = arith.constant 0 : i32
    %c0_i32_0 = arith.constant 0 : i32
    return %c0_i32, %arg2 : i32, i32
  }
  func.func @transform_3(%arg0: i32, %arg1: i32, %arg2: i32) -> (i32, i32, i32, i32) {
    %c0_i32 = arith.constant 0 : i32
    %c0_i32_0 = arith.constant 0 : i32
    return %arg0, %arg1, %c0_i32, %arg2 : i32, i32, i32, i32
  }
}

</mosaic_0001>

<bundles_post_ra>
// kernel: conv_relu.1
= control target key start
LH: loop header
LB: loop body
LE: loop exit
PB: predicated region body
PF: predicated region fallthrough
CT: control target
= control target key end

     0   :  { %s3253_s12 = smov 0   ;;  %s3255_s13 = smov 0   ;;  %s4021_s0 = inlined_call_operand.vmem [shape: f32[2,18,18,4], index: 0, kind: input, shape index: {}]   ;;  %s4022_s1 = inlined_call_operand.vmem [shape: f32[9,4,128], index: 1, kind: input, shape index: {}]   ;;  %s4023_s2 = inlined_call_operand.vmem [shape: f32[1,128], index: 2, kind: input, shape index: {}]   ;;  %s4024_s3 = inlined_call_operand.vmem [shape: f32[2,16,16,128], index: 3, kind: output, shape index: {}]  }
   0x1   :  { %s3257_s14 = smov 0   ;;  %s3259_s15 = smov 0  }
   0x2   :  { %s3261_s16 = smov 0  }
   0x3 LB: > { %s28_s17 = sadd.s32 1, %s3223_s14  ;;  %s32_s18 = sadd.s32 1, %s3227_s15  ;;  %s3231_s16 = sphi %s3261_s16, %s13_s16   ;;  %s3227_s15 = sphi %s3259_s15, %s4064_s15   ;;  %s3223_s14 = sphi %s3257_s14, %s4063_s14   ;;  %s3219_s13 = sphi %s3255_s13, %s4062_s13   ;;  %s3215_s12 = sphi %s3253_s12, %s4061_s12  }
   0x4   : > { %p30_p0 = scmp.ge.s32.totalorder %s28_s17, 2  ;;  %p2491_p1 = scmp.ge.s32.totalorder %s3231_s16, 1 }
   0x5   : > { %p177_p2 = scmp.lt.s32.totalorder %s3231_s16, 5 }
   0x6   : > { %s4066_s17 = smov (%p30_p0, %s28_s17), 0  ;;  %s4068_s18 = smov (!%p30_p0, %s32_s18), %s3227_s15 }
   0x7   : > { %p178_p3 = pnand %p2491_p1, %p177_p2  ;;  %p34_p4 = scmp.ge.s32.totalorder %s4068_s18, 2 }
   0x9   : > { %s4070_s18 = smov (%p34_p4, %s4068_s18), 0  ;;  %181 = sbr.rel (%p178_p3) target bundleno = 368 (0x170), region = 32 }
   0xe   : > { %v2499_v0 = vld [vmem:[%s4022_s1 + $0x4] sm:$0xf]  ;;  %vm329_vm0 = vcmask 1043456   ;;  %p216_p5 = scmp.lt.s32.totalorder %s3219_s13, 1  ;;  %v261_v1 = vld [vmem:[%s4022_s1] sm:$0xf] }
   0xf   : > { %3150 = vmatprep.subr.msk.mxu1 %vm329_vm0, %v2499_v0  ;;  %2916 = vmatprep.subr.msk.mxu0 %vm329_vm0, %v2499_v0  ;;  %v2534_v2 = vld [vmem:[%s4022_s1 + $0x8] sm:$0xf]  ;;  %s2498_s25 = smul.u32 192, %s3215_s12  ;;  %vm280_vm1 = vcmask 31744   ;;  %v2570_v9 = vld [vmem:[%s4022_s1 + $0xc] sm:$0xf] }
  0x10   : > { %3151 = vmatpush3.msk.msra.mxu1 %vm329_vm0, %v2499_v0  ;;  %2917 = vmatpush3.msk.msra.mxu0 %vm329_vm0, %v2499_v0  ;;  %s4072_s13 = smov (!%p216_p5, %s3219_s13), 1  ;;  %v2604_v10 = vld [vmem:[%s4022_s1 + $0x10] sm:$0xf]  ;;  %v3410_v27 = vld [vmem:[%s4022_s1 + $0x14] sm:$0xf]  ;;  %s2493_s23 = sshll.u32 %s3215_s12, 3 }
  0x11   : > { %2942 = vmatprep.subr.msk.mxu1 %vm329_vm0, %v261_v1  ;;  %2968 = vmatprep.subr.msk.mxu0 %vm329_vm0, %v2534_v2  ;;  %s3152_s26 = smul.u32 432, %s4072_s13  ;;  %v3415_v28 = vld [vmem:[%s4022_s1 + $0x18] sm:$0xf]  ;;  %v2708_v55 = vld [vmem:[%s4022_s1 + $0x1c] sm:$0xf]  ;;  %p231_p6 = scmp.lt.s32.totalorder %s2493_s23, 15 }
  0x12   : > { %v2742_v56 = vld [vmem:[%s4022_s1 + $0x20] sm:$0xf]  ;;  %s2495_s24 = sshll.u32 %s4072_s13, 5 }
  0x13   : > { %s220_s29 = scalar_lea.vmem %s4021_s0, %s3152_s26  ;;  %s4074_s23 = smov (!%p231_p6, %s2493_s23), 15 }
  0x14   : > { %s3307_s30 = scalar_lea.vmem %s220_s29, %s2498_s25  ;;  %s2494_s12 = sshll.u32 %s4074_s23, 1 }
  0x15   : > { %v262_v3 = vld [vmem:[%s3307_s30 + $0x1] sm:$0xff]  ;;  %v263_v5 = vld [vmem:[%s3307_s30 + $0x9] sm:$0xff]  ;;  %v3321_v7 = vld [vmem:[%s3307_s30 + $0x19] sm:$0xff]  ;;  %s3909_s25 = sadd.s32 %s2495_s24, %s2494_s12 }
  0x16   : > { %v3311_v4 = vld [vmem:[%s3307_s30 + $0x61] sm:$0xff]  ;;  %2918 = vmatprep.mubr.msk.f32.mxu0 %vm280_vm1, %v262_v3  ;;  %v3318_v6 = vld [vmem:[%s3307_s30 + $0x69] sm:$0xff]  ;;  %v3324_v8 = vld [vmem:[%s3307_s30 + $0x79] sm:$0xff]  ;;  %s2496_s27 = sshll.u32 %s3909_s25, 3 }
  0x17   : > { %2930 = vmatprep.mubr.msk.f32.mxu1 %vm280_vm1, %v3311_v4  ;;  %2919 = vmatmul.mubr.msk.f32.vlgmr.msra.gmra.mxu0 %vm280_vm1, %v263_v5  ;;  %v3338_v11 = vld [vmem:[%s3307_s30 + $0x21] sm:$0xff]  ;;  %v3348_v13 = vld [vmem:[%s3307_s30 + $0x31] sm:$0xff]  ;;  %v3364_v15 = vld [vmem:[%s3307_s30 + $0x39] sm:$0xff] }
  0x18   : > { %2931 = vmatmul.mubr.msk.f32.vlgmr.msra.gmra.mxu1 %vm280_vm1, %v3318_v6  ;;  %2969 = vmatpush3.msk.msra.mxu0 %vm329_vm0, %v2534_v2  ;;  %v3341_v12 = vld [vmem:[%s3307_s30 + $0x81] sm:$0xff]  ;;  %v3351_v14 = vld [vmem:[%s3307_s30 + $0x91] sm:$0xff]  ;;  %v3367_v16 = vld [vmem:[%s3307_s30 + $0x99] sm:$0xff] }
  0x19   : > { %2943 = vmatpush3.msk.msra.mxu1 %vm329_vm0, %v261_v1  ;;  %2921 = vmatprep.mubr.msk.f32.mxu0 %vm280_vm1, %v3321_v7  ;;  %v3370_v17 = vld [vmem:[%s3307_s30 + $0x49] sm:$0xff]  ;;  %v3384_v19 = vld [vmem:[%s3307_s30 + $0x51] sm:$0xff]  ;;  %v245_v21 = vld [vmem:[%s3307_s30] sm:$0xff] }
  0x1a   : > { %2933 = vmatprep.mubr.msk.f32.mxu1 %vm280_vm1, %v3324_v8  ;;  %2994 = vmatprep.subr.msk.mxu1 %vm329_vm0, %v2570_v9  ;;  %v3373_v18 = vld [vmem:[%s3307_s30 + $0xa9] sm:$0xff]  ;;  %v3387_v20 = vld [vmem:[%s3307_s30 + $0xb1] sm:$0xff]  ;;  %v3403_v26 = vld [vmem:[%s3307_s30 + $0x1a] sm:$0xff] }
  0x1b   : > { %3020 = vmatprep.subr.msk.mxu0 %vm329_vm0, %v2604_v10  ;;  %2922 = vmatmul.mubr.msk.f32.gmra.mxu0 %vm280_vm1, %v3338_v11  ;;  %v674_v22 = vld [vmem:[%s3307_s30 + $0x2] sm:$0xff]  ;;  %v675_v24 = vld [vmem:[%s3307_s30 + $0xa] sm:$0xff]  ;;  %v3400_v25 = vld [vmem:[%s3307_s30 + $0x18] sm:$0xff] }
  0x1c   : > { %2934 = vmatmul.mubr.msk.f32.gmra.mxu1 %vm280_vm1, %v3341_v12  ;;  %2924 = vmatprep.mubr.msk.f32.mxu0 %vm280_vm1, %v3348_v13  ;;  %v246_v23 = vld [vmem:[%s3307_s30 + $0x8] sm:$0xff]  ;;  %v248_v29 = vld [vmem:[%s3307_s30 + $0x20] sm:$0xff]  ;;  %v3428_v31 = vld [vmem:[%s3307_s30 + $0x30] sm:$0xff] }
  0x1d   : > { %2936 = vmatprep.mubr.msk.f32.mxu1 %vm280_vm1, %v3351_v14  ;;  %v3421_v30 = vld [vmem:[%s3307_s30 + $0x22] sm:$0xff]  ;;  %v3431_v32 = vld [vmem:[%s3307_s30 + $0x32] sm:$0xff]  ;;  %v3448_v34 = vld [vmem:[%s3307_s30 + $0x3a] sm:$0xff] }
  0x1e   : > { %v3445_v33 = vld [vmem:[%s3307_s30 + $0x38] sm:$0xff]  ;;  %v3451_v35 = vld [vmem:[%s3307_s30 + $0x48] sm:$0xff]  ;;  %v3465_v37 = vld [vmem:[%s3307_s30 + $0x50] sm:$0xff] }
  0x1f   : > { %2925 = vmatmul.mubr.msk.f32.gmra.mxu0 %vm280_vm1, %v3364_v15  ;;  %v3454_v36 = vld [vmem:[%s3307_s30 + $0x4a] sm:$0xff]  ;;  %v3468_v38 = vld [vmem:[%s3307_s30 + $0x52] sm:$0xff]  ;;  %v3471_v39 = vld [vmem:[%s3307_s30 + $0x60] sm:$0xff] }
  0x20   : > { %2937 = vmatmul.mubr.msk.f32.gmra.mxu1 %vm280_vm1, %v3367_v16  ;;  %2927 = vmatprep.mubr.msk.f32.mxu0 %vm280_vm1, %v3370_v17  ;;  %v3474_v40 = vld [vmem:[%s3307_s30 + $0x62] sm:$0xff]  ;;  %v3488_v42 = vld [vmem:[%s3307_s30 + $0x6a] sm:$0xff]  ;;  %v3491_v43 = vld [vmem:[%s3307_s30 + $0x78] sm:$0xff] }
  0x21   : > { %2939 = vmatprep.mubr.msk.f32.mxu1 %vm280_vm1, %v3373_v18  ;;  %v3485_v41 = vld [vmem:[%s3307_s30 + $0x68] sm:$0xff]  ;;  %v3494_v44 = vld [vmem:[%s3307_s30 + $0x7a] sm:$0xff]  ;;  %v3511_v47 = vld [vmem:[%s3307_s30 + $0x90] sm:$0xff] }
  0x22   : > { %v3505_v45 = vld [vmem:[%s3307_s30 + $0x80] sm:$0xff]  ;;  %v3514_v48 = vld [vmem:[%s3307_s30 + $0x92] sm:$0xff]  ;;  %v3531_v51 = vld [vmem:[%s3307_s30 + $0xa8] sm:$0xff] }
  0x23   : > { %2928 = vmatmul.mubr.msk.f32.gmra.mxu0 %vm280_vm1, %v3384_v19  ;;  %v3508_v46 = vld [vmem:[%s3307_s30 + $0x82] sm:$0xff]  ;;  %v3525_v49 = vld [vmem:[%s3307_s30 + $0x98] sm:$0xff]  ;;  %v3534_v52 = vld [vmem:[%s3307_s30 + $0xaa] sm:$0xff] }
  0x24   : > { %2940 = vmatmul.mubr.msk.f32.gmra.mxu1 %vm280_vm1, %v3387_v20  ;;  %2970 = vmatprep.mubr.msk.f32.mxu0 %vm280_vm1, %v674_v22  ;;  %v3528_v50 = vld [vmem:[%s3307_s30 + $0x9a] sm:$0xff]  ;;  %v3545_v53 = vld [vmem:[%s3307_s30 + $0xb0] sm:$0xff]  ;;  %v2569_v59 = vld [vmem:[%s3307_s30 + $0xc8] sm:$0xff] }
  0x25   : > { %2944 = vmatprep.mubr.msk.f32.mxu1 %vm280_vm1, %v245_v21  ;;  %v3548_v54 = vld [vmem:[%s3307_s30 + $0xb2] sm:$0xff]  ;;  %v2568_v57 = vld [vmem:[%s3307_s30 + $0xc0] sm:$0xff]  ;;  %v3630_v60 = vld [vmem:[%s3307_s30 + $0xc9] sm:$0xff] }
  0x26   : > { %v3619_v58 = vld [vmem:[%s3307_s30 + $0xc1] sm:$0xff]  ;;  %v2672_v62 = vld [vmem:[%s3307_s30 + $0xd8] sm:$0xff]  ;;  %v2637_v63 = vld [vmem:[%s3307_s30 + $0xca] sm:$0xff] }
  0x27   : > { %2971 = vmatmul.mubr.msk.f32.vlgmr.msra.gmra.mxu0 %vm280_vm1, %v675_v24  ;;  %v2636_v61 = vld [vmem:[%s3307_s30 + $0xc2] sm:$0xff]  ;;  %v2706_v1 = vld [vmem:[%s3307_s30 + $0xd9] sm:$0xff] }
  0x28   : > { %2945 = vmatmul.mubr.msk.f32.vlgmr.msra.gmra.mxu1 %vm280_vm1, %v246_v23  ;;  %3021 = vmatpush3.msk.msra.mxu0 %vm329_vm0, %v2604_v10  ;;  %v2673_v0 = vld [vmem:[%s3307_s30 + $0xe0] sm:$0xff] }
  0x29   : > { %2995 = vmatpush3.msk.msra.mxu1 %vm329_vm0, %v2570_v9  ;;  %2947 = vmatprep.mubr.msk.f32.mxu1 %vm280_vm1, %v3400_v25  ;;  %v2740_v2 = vld [vmem:[%s3307_s30 + $0xda] sm:$0xff] }
  0x2a   : > { %2973 = vmatprep.mubr.msk.f32.mxu0 %vm280_vm1, %v3403_v26  ;;  %3046 = vmatprep.subr.msk.mxu1 %vm329_vm0, %v3410_v27  ;;  %v2707_v3 = vld [vmem:[%s3307_s30 + $0xe1] sm:$0xff] }
  0x2b   : > { %3072 = vmatprep.subr.msk.mxu0 %vm329_vm0, %v3415_v28  ;;  %2974 = vmatmul.mubr.msk.f32.gmra.mxu0 %vm280_vm1, %v3421_v30 }
  0x2c   : > { %2948 = vmatmul.mubr.msk.f32.gmra.mxu1 %vm280_vm1, %v248_v29  ;;  %2976 = vmatprep.mubr.msk.f32.mxu0 %vm280_vm1, %v3431_v32 }
  0x2d   : > { %2950 = vmatprep.mubr.msk.f32.mxu1 %vm280_vm1, %v3428_v31 }
  0x2f   : > { %2977 = vmatmul.mubr.msk.f32.gmra.mxu0 %vm280_vm1, %v3448_v34 }
  0x30   : > { %2951 = vmatmul.mubr.msk.f32.gmra.mxu1 %vm280_vm1, %v3445_v33  ;;  %2979 = vmatprep.mubr.msk.f32.mxu0 %vm280_vm1, %v3454_v36 }
  0x31   : > { %2953 = vmatprep.mubr.msk.f32.mxu1 %vm280_vm1, %v3451_v35 }
  0x33   : > { %2980 = vmatmul.mubr.msk.f32.gmra.mxu0 %vm280_vm1, %v3468_v38 }
  0x34   : > { %2954 = vmatmul.mubr.msk.f32.gmra.mxu1 %vm280_vm1, %v3465_v37  ;;  %2982 = vmatprep.mubr.msk.f32.mxu0 %vm280_vm1, %v3474_v40 }
  0x35   : > { %2956 = vmatprep.mubr.msk.f32.mxu1 %vm280_vm1, %v3471_v39 }
  0x37   : > { %2983 = vmatmul.mubr.msk.f32.gmra.mxu0 %vm280_vm1, %v3488_v42 }
  0x38   : > { %2957 = vmatmul.mubr.msk.f32.gmra.mxu1 %vm280_vm1, %v3485_v41  ;;  %2985 = vmatprep.mubr.msk.f32.mxu0 %vm280_vm1, %v3494_v44 }
  0x39   : > { %2959 = vmatprep.mubr.msk.f32.mxu1 %vm280_vm1, %v3491_v43 }
  0x3b   : > { %2986 = vmatmul.mubr.msk.f32.gmra.mxu0 %vm280_vm1, %v3508_v46 }
  0x3c   : > { %2960 = vmatmul.mubr.msk.f32.gmra.mxu1 %vm280_vm1, %v3505_v45  ;;  %2988 = vmatprep.mubr.msk.f32.mxu0 %vm280_vm1, %v3514_v48 }
  0x3d   : > { %2962 = vmatprep.mubr.msk.f32.mxu1 %vm280_vm1, %v3511_v47 }
  0x3f   : > { %2989 = vmatmul.mubr.msk.f32.gmra.mxu0 %vm280_vm1, %v3528_v50 }
  0x40   : > { %2963 = vmatmul.mubr.msk.f32.gmra.mxu1 %vm280_vm1, %v3525_v49  ;;  %2991 = vmatprep.mubr.msk.f32.mxu0 %vm280_vm1, %v3534_v52 }
  0x41   : > { %2965 = vmatprep.mubr.msk.f32.mxu1 %vm280_vm1, %v3531_v51 }
  0x43   : > { %2992 = vmatmul.mubr.msk.f32.gmra.mxu0 %vm280_vm1, %v3548_v54 }
  0x44   : > { %2966 = vmatmul.mubr.msk.f32.gmra.mxu1 %vm280_vm1, %v3545_v53  ;;  %3022 = vmatprep.mubr.msk.f32.mxu0 %vm280_vm1, %v3321_v7 }
  0x45   : > { %2996 = vmatprep.mubr.msk.f32.mxu1 %vm280_vm1, %v3400_v25 }
  0x47   : > { %3023 = vmatmul.mubr.msk.f32.vlgmr.msra.gmra.mxu0 %vm280_vm1, %v3338_v11 }
  0x48   : > { %2997 = vmatmul.mubr.msk.f32.vlgmr.msra.gmra.mxu1 %vm280_vm1, %v248_v29  ;;  %3073 = vmatpush3.msk.msra.mxu0 %vm329_vm0, %v3415_v28 }
  0x49   : > { %3047 = vmatpush3.msk.msra.mxu1 %vm329_vm0, %v3410_v27  ;;  %2999 = vmatprep.mubr.msk.f32.mxu1 %vm280_vm1, %v3428_v31 }
  0x4a   : > { %3025 = vmatprep.mubr.msk.f32.mxu0 %vm280_vm1, %v3348_v13  ;;  %3098 = vmatprep.subr.msk.mxu1 %vm329_vm0, %v2708_v55 }
  0x4b   : > { %3124 = vmatprep.subr.msk.mxu0 %vm329_vm0, %v2742_v56  ;;  %3026 = vmatmul.mubr.msk.f32.gmra.mxu0 %vm280_vm1, %v3364_v15 }
  0x4c   : > { %3000 = vmatmul.mubr.msk.f32.gmra.mxu1 %vm280_vm1, %v3445_v33  ;;  %3028 = vmatprep.mubr.msk.f32.mxu0 %vm280_vm1, %v3370_v17 }
  0x4d   : > { %3002 = vmatprep.mubr.msk.f32.mxu1 %vm280_vm1, %v3451_v35 }
  0x4f   : > { %3029 = vmatmul.mubr.msk.f32.gmra.mxu0 %vm280_vm1, %v3384_v19 }
  0x50   : > { %3003 = vmatmul.mubr.msk.f32.gmra.mxu1 %vm280_vm1, %v3465_v37  ;;  %3031 = vmatprep.mubr.msk.f32.mxu0 %vm280_vm1, %v3311_v4 }
  0x51   : > { %3005 = vmatprep.mubr.msk.f32.mxu1 %vm280_vm1, %v3471_v39 }
  0x53   : > { %3032 = vmatmul.mubr.msk.f32.gmra.mxu0 %vm280_vm1, %v3318_v6 }
  0x54   : > { %3006 = vmatmul.mubr.msk.f32.gmra.mxu1 %vm280_vm1, %v3485_v41  ;;  %3034 = vmatprep.mubr.msk.f32.mxu0 %vm280_vm1, %v3324_v8 }
  0x55   : > { %3008 = vmatprep.mubr.msk.f32.mxu1 %vm280_vm1, %v3491_v43 }
  0x57   : > { %3035 = vmatmul.mubr.msk.f32.gmra.mxu0 %vm280_vm1, %v3341_v12 }
  0x58   : > { %3009 = vmatmul.mubr.msk.f32.gmra.mxu1 %vm280_vm1, %v3505_v45  ;;  %3037 = vmatprep.mubr.msk.f32.mxu0 %vm280_vm1, %v3351_v14 }
  0x59   : > { %3011 = vmatprep.mubr.msk.f32.mxu1 %vm280_vm1, %v3511_v47 }
  0x5b   : > { %3038 = vmatmul.mubr.msk.f32.gmra.mxu0 %vm280_vm1, %v3367_v16 }
  0x5c   : > { %3012 = vmatmul.mubr.msk.f32.gmra.mxu1 %vm280_vm1, %v3525_v49  ;;  %3040 = vmatprep.mubr.msk.f32.mxu0 %vm280_vm1, %v3373_v18 }
  0x5d   : > { %3014 = vmatprep.mubr.msk.f32.mxu1 %vm280_vm1, %v3531_v51 }
  0x5f   : > { %3041 = vmatmul.mubr.msk.f32.gmra.mxu0 %vm280_vm1, %v3387_v20 }
  0x60   : > { %3015 = vmatmul.mubr.msk.f32.gmra.mxu1 %vm280_vm1, %v3545_v53  ;;  %3043 = vmatprep.mubr.msk.f32.mxu0 %vm280_vm1, %v3619_v58 }
  0x61   : > { %3017 = vmatprep.mubr.msk.f32.mxu1 %vm280_vm1, %v2568_v57 }
  0x63   : > { %3044 = vmatmul.mubr.msk.f32.gmra.mxu0 %vm280_vm1, %v3630_v60 }
  0x64   : > { %3018 = vmatmul.mubr.msk.f32.gmra.mxu1 %vm280_vm1, %v2569_v59  ;;  %3074 = vmatprep.mubr.msk.f32.mxu0 %vm280_vm1, %v3428_v31 }
  0x65   : > { %3048 = vmatprep.mubr.msk.f32.mxu1 %vm280_vm1, %v3403_v26 }
  0x67   : > { %3075 = vmatmul.mubr.msk.f32.vlgmr.msra.gmra.mxu0 %vm280_vm1, %v3445_v33 }
  0x68   : > { %3049 = vmatmul.mubr.msk.f32.vlgmr.msra.gmra.mxu1 %vm280_vm1, %v3421_v30  ;;  %3125 = vmatpush3.msk.msra.mxu0 %vm329_vm0, %v2742_v56 }
  0x69   : > { %3099 = vmatpush3.msk.msra.mxu1 %vm329_vm0, %v2708_v55  ;;  %3051 = vmatprep.mubr.msk.f32.mxu1 %vm280_vm1, %v3431_v32 }
  0x6a   : > { %3077 = vmatprep.mubr.msk.f32.mxu0 %vm280_vm1, %v3451_v35 }
  0x6b   : > { %3078 = vmatmul.mubr.msk.f32.gmra.mxu0 %vm280_vm1, %v3465_v37 }
  0x6c   : > { %3052 = vmatmul.mubr.msk.f32.gmra.mxu1 %vm280_vm1, %v3448_v34  ;;  %3080 = vmatprep.mubr.msk.f32.mxu0 %vm280_vm1, %v3471_v39 }
  0x6d   : > { %3054 = vmatprep.mubr.msk.f32.mxu1 %vm280_vm1, %v3454_v36 }
  0x6f   : > { %3081 = vmatmul.mubr.msk.f32.gmra.mxu0 %vm280_vm1, %v3485_v41 }
  0x70   : > { %3055 = vmatmul.mubr.msk.f32.gmra.mxu1 %vm280_vm1, %v3468_v38  ;;  %3083 = vmatprep.mubr.msk.f32.mxu0 %vm280_vm1, %v3491_v43 }
  0x71   : > { %3057 = vmatprep.mubr.msk.f32.mxu1 %vm280_vm1, %v3474_v40 }
  0x73   : > { %3084 = vmatmul.mubr.msk.f32.gmra.mxu0 %vm280_vm1, %v3505_v45 }
  0x74   : > { %3058 = vmatmul.mubr.msk.f32.gmra.mxu1 %vm280_vm1, %v3488_v42  ;;  %3086 = vmatprep.mubr.msk.f32.mxu0 %vm280_vm1, %v3511_v47 }
  0x75   : > { %3060 = vmatprep.mubr.msk.f32.mxu1 %vm280_vm1, %v3494_v44 }
  0x77   : > { %3087 = vmatmul.mubr.msk.f32.gmra.mxu0 %vm280_vm1, %v3525_v49 }
  0x78   : > { %3061 = vmatmul.mubr.msk.f32.gmra.mxu1 %vm280_vm1, %v3508_v46  ;;  %3089 = vmatprep.mubr.msk.f32.mxu0 %vm280_vm1, %v3531_v51 }
  0x79   : > { %3063 = vmatprep.mubr.msk.f32.mxu1 %vm280_vm1, %v3514_v48 }
  0x7b   : > { %3090 = vmatmul.mubr.msk.f32.gmra.mxu0 %vm280_vm1, %v3545_v53 }
  0x7c   : > { %3064 = vmatmul.mubr.msk.f32.gmra.mxu1 %vm280_vm1, %v3528_v50  ;;  %3092 = vmatprep.mubr.msk.f32.mxu0 %vm280_vm1, %v2568_v57 }
  0x7d   : > { %3066 = vmatprep.mubr.msk.f32.mxu1 %vm280_vm1, %v3534_v52 }
  0x7f   : > { %3093 = vmatmul.mubr.msk.f32.gmra.mxu0 %vm280_vm1, %v2569_v59 }
  0x80   : > { %3067 = vmatmul.mubr.msk.f32.gmra.mxu1 %vm280_vm1, %v3548_v54  ;;  %3095 = vmatprep.mubr.msk.f32.mxu0 %vm280_vm1, %v2672_v62 }
  0x81   : > { %3069 = vmatprep.mubr.msk.f32.mxu1 %vm280_vm1, %v2636_v61 }
  0x83   : > { %3096 = vmatmul.mubr.msk.f32.gmra.mxu0 %vm280_vm1, %v2673_v0 }
  0x84   : > { %3070 = vmatmul.mubr.msk.f32.gmra.mxu1 %vm280_vm1, %v2637_v63  ;;  %3126 = vmatprep.mubr.msk.f32.mxu0 %vm280_vm1, %v3431_v32 }
  0x85   : > { %3100 = vmatprep.mubr.msk.f32.mxu1 %vm280_vm1, %v3348_v13 }
  0x87   : > { %3127 = vmatmul.mubr.msk.f32.vlgmr.msra.gmra.mxu0 %vm280_vm1, %v3448_v34 }
  0x88   : > { %3101 = vmatmul.mubr.msk.f32.vlgmr.msra.gmra.mxu1 %vm280_vm1, %v3364_v15  ;;  %3129 = vmatprep.mubr.msk.f32.mxu0 %vm280_vm1, %v3454_v36 }
  0x89   : > { %3103 = vmatprep.mubr.msk.f32.mxu1 %vm280_vm1, %v3370_v17 }
  0x8b   : > { %3130 = vmatmul.mubr.msk.f32.gmra.mxu0 %vm280_vm1, %v3468_v38 }
  0x8c   : > { %3104 = vmatmul.mubr.msk.f32.gmra.mxu1 %vm280_vm1, %v3384_v19  ;;  %3132 = vmatprep.mubr.msk.f32.mxu0 %vm280_vm1, %v3474_v40 }
  0x8d   : > { %3106 = vmatprep.mubr.msk.f32.mxu1 %vm280_vm1, %v3311_v4  ;;  %v2741_v4 = vld [vmem:[%s3307_s30 + $0xe2] sm:$0xff]  ;;  %s3933_s30 = scalar_lea.vmem %s4024_s3, %s2496_s27 }
  0x8f   : > { %3133 = vmatmul.mubr.msk.f32.gmra.mxu0 %vm280_vm1, %v3488_v42 }
  0x90   : > { %3107 = vmatmul.mubr.msk.f32.gmra.mxu1 %vm280_vm1, %v3318_v6  ;;  %3135 = vmatprep.mubr.msk.f32.mxu0 %vm280_vm1, %v3494_v44 }
  0x91   : > { %3109 = vmatprep.mubr.msk.f32.mxu1 %vm280_vm1, %v3324_v8 }
  0x93   : > { %3136 = vmatmul.mubr.msk.f32.gmra.mxu0 %vm280_vm1, %v3508_v46 }
  0x94   : > { %3110 = vmatmul.mubr.msk.f32.gmra.mxu1 %vm280_vm1, %v3341_v12  ;;  %3138 = vmatprep.mubr.msk.f32.mxu0 %vm280_vm1, %v3514_v48 }
  0x95   : > { %3112 = vmatprep.mubr.msk.f32.mxu1 %vm280_vm1, %v3351_v14 }
  0x97   : > { %3139 = vmatmul.mubr.msk.f32.gmra.mxu0 %vm280_vm1, %v3528_v50 }
  0x98   : > { %3113 = vmatmul.mubr.msk.f32.gmra.mxu1 %vm280_vm1, %v3367_v16  ;;  %3141 = vmatprep.mubr.msk.f32.mxu0 %vm280_vm1, %v3534_v52 }
  0x99   : > { %3115 = vmatprep.mubr.msk.f32.mxu1 %vm280_vm1, %v3373_v18 }
  0x9b   : > { %3142 = vmatmul.mubr.msk.f32.gmra.mxu0 %vm280_vm1, %v3548_v54 }
  0x9c   : > { %3116 = vmatmul.mubr.msk.f32.gmra.mxu1 %vm280_vm1, %v3387_v20  ;;  %3144 = vmatprep.mubr.msk.f32.mxu0 %vm280_vm1, %v2636_v61 }
  0x9d   : > { %3118 = vmatprep.mubr.msk.f32.mxu1 %vm280_vm1, %v3619_v58 }
  0x9f   : > { %3145 = vmatmul.mubr.msk.f32.gmra.mxu0 %vm280_vm1, %v2637_v63 }
  0xa0   : > { %3119 = vmatmul.mubr.msk.f32.gmra.mxu1 %vm280_vm1, %v3630_v60  ;;  %3147 = vmatprep.mubr.msk.f32.mxu0 %vm280_vm1, %v2740_v2 }
  0xa1   : > { %3121 = vmatprep.mubr.msk.f32.mxu1 %vm280_vm1, %v2706_v1 }
  0xa3   : > { %3148 = vmatmul.mubr.msk.f32.gmra.mxu0 %vm280_vm1, %v2741_v4 }
  0xa4   : > { %3122 = vmatmul.mubr.msk.f32.gmra.mxu1 %vm280_vm1, %v2707_v3 }
  0xd7   : > { %v2920_v5 = vpop.f32.mrf.mxu0 }
  0xd8   : > { %v2932_v6 = vpop.f32.mrf.mxu1 }
  0xd9   : > { %v399_v7 = vpop.f32.mrf.mxu0 }
  0xda   : > { %v439_v8 = vpop.f32.mrf.mxu1 }
  0xdb   : > { %v2923_v9 = vpop.f32.mrf.mxu0 }
  0xdc   : > { %v2935_v10 = vpop.f32.mrf.mxu1 }
  0xdd   : > { %v409_v11 = vpop.f32.mrf.mxu0 }
  0xde   : > { %v449_v12 = vpop.f32.mrf.mxu1 }
  0xdf   : > { %v2926_v13 = vpop.f32.mrf.mxu0 }
  0xe0   : > { %v2938_v14 = vpop.f32.mrf.mxu1 }
  0xe1   : > { %v419_v15 = vpop.f32.mrf.mxu0 }
  0xe2   : > { %v459_v16 = vpop.f32.mrf.mxu1 }
  0xe3   : > { %v2929_v17 = vpop.f32.mrf.mxu0 }
  0xe4   : > { %v2941_v18 = vpop.f32.mrf.mxu1 }
  0xe5   : > { %v429_v19 = vpop.f32.mrf.mxu0 }
  0xe6   : > { %v3761_v20 = vpop.f32.mrf.mxu1 }
  0xe7   : > { %v2972_v22 = vpop.f32.mrf.mxu0 }
  0xe8   : > { %v2946_v21 = vpop.f32.mrf.mxu1 }
  0xe9   : > { %v601_v23 = vadd.f32 %v2946_v21, %v2920_v5  ;;  %v809_v25 = vpop.f32.mrf.mxu0 }
  0xea   : > { %v595_v24 = vpop.f32.mrf.mxu1 }
  0xeb   : > { %v3763_v26 = vadd.f32 %v2972_v22, %v601_v23  ;;  %v596_v27 = vadd.f32 %v595_v24, %v399_v7  ;;  %v2975_v29 = vpop.f32.mrf.mxu0 }
  0xec   : > { %v2949_v28 = vpop.f32.mrf.mxu1 }
  0xed   : > { %v3765_v30 = vadd.f32 %v809_v25, %v596_v27  ;;  %v611_v31 = vadd.f32 %v2949_v28, %v2923_v9  ;;  %v819_v33 = vpop.f32.mrf.mxu0 }
  0xee   : > { %v605_v32 = vpop.f32.mrf.mxu1 }
  0xef   : > { %v3767_v34 = vadd.f32 %v2975_v29, %v611_v31  ;;  %v606_v35 = vadd.f32 %v605_v32, %v409_v11  ;;  %v2978_v37 = vpop.f32.mrf.mxu0 }
  0xf0   : > { %v2952_v36 = vpop.f32.mrf.mxu1 }
  0xf1   : > { %v3769_v38 = vadd.f32 %v819_v33, %v606_v35  ;;  %v621_v39 = vadd.f32 %v2952_v36, %v2926_v13  ;;  %v829_v41 = vpop.f32.mrf.mxu0 }
  0xf2   : > { %v615_v40 = vpop.f32.mrf.mxu1 }
  0xf3   : > { %v3771_v42 = vadd.f32 %v2978_v37, %v621_v39  ;;  %v616_v43 = vadd.f32 %v615_v40, %v419_v15  ;;  %v2981_v45 = vpop.f32.mrf.mxu0 }
  0xf4   : > { %v2955_v44 = vpop.f32.mrf.mxu1 }
  0xf5   : > { %v3773_v46 = vadd.f32 %v829_v41, %v616_v43  ;;  %v631_v47 = vadd.f32 %v2955_v44, %v2929_v17  ;;  %v839_v49 = vpop.f32.mrf.mxu0 }
  0xf6   : > { %v625_v48 = vpop.f32.mrf.mxu1 }
  0xf7   : > { %v3775_v50 = vadd.f32 %v2981_v45, %v631_v47  ;;  %v626_v51 = vadd.f32 %v625_v48, %v429_v19  ;;  %v2984_v53 = vpop.f32.mrf.mxu0 }
  0xf8   : > { %v2958_v52 = vpop.f32.mrf.mxu1 }
  0xf9   : > { %v3777_v54 = vadd.f32 %v839_v49, %v626_v51  ;;  %v641_v55 = vadd.f32 %v2958_v52, %v2932_v6  ;;  %v849_v57 = vpop.f32.mrf.mxu0 }
  0xfa   : > { %v635_v56 = vpop.f32.mrf.mxu1 }
  0xfb   : > { %v3779_v58 = vadd.f32 %v2984_v53, %v641_v55  ;;  %v636_v59 = vadd.f32 %v635_v56, %v439_v8  ;;  %v2987_v61 = vpop.f32.mrf.mxu0 }
  0xfc   : > { %v2961_v60 = vpop.f32.mrf.mxu1 }
  0xfd   : > { %v3781_v62 = vadd.f32 %v849_v57, %v636_v59  ;;  %v651_v63 = vadd.f32 %v2961_v60, %v2935_v10  ;;  %v859_v1 = vpop.f32.mrf.mxu0 }
  0xfe   : > { %v645_v0 = vpop.f32.mrf.mxu1 }
  0xff   : > { %v3783_v2 = vadd.f32 %v2987_v61, %v651_v63  ;;  %v646_v3 = vadd.f32 %v645_v0, %v449_v12  ;;  %v2990_v5 = vpop.f32.mrf.mxu0 }
 0x100   : > { %v2964_v4 = vpop.f32.mrf.mxu1 }
 0x101   : > { %v3785_v7 = vadd.f32 %v859_v1, %v646_v3  ;;  %v661_v6 = vadd.f32 %v2964_v4, %v2938_v14  ;;  %v869_v11 = vpop.f32.mrf.mxu0 }
 0x102   : > { %v655_v9 = vpop.f32.mrf.mxu1 }
 0x103   : > { %v3787_v13 = vadd.f32 %v2990_v5, %v661_v6  ;;  %v656_v8 = vadd.f32 %v655_v9, %v459_v16  ;;  %v2993_v17 = vpop.f32.mrf.mxu0 }
 0x104   : > { %v2967_v15 = vpop.f32.mrf.mxu1 }
 0x105   : > { %v3789_v19 = vadd.f32 %v869_v11, %v656_v8  ;;  %v671_v10 = vadd.f32 %v2967_v15, %v2941_v18  ;;  %v879_v22 = vpop.f32.mrf.mxu0 }
 0x106   : > { %v665_v21 = vpop.f32.mrf.mxu1 }
 0x107   : > { %4025 = vst [vmem:[#allocation2_spill] sm:$0xff] %v3789_v19  ;;  %v3791_v23 = vadd.f32 %v2993_v17, %v671_v10  ;;  %v666_v12 = vadd.f32 %v665_v21, %v3761_v20  ;;  %v3024_v25 = vpop.f32.mrf.mxu0 }
 0x108   : > { %v2998_v24 = vpop.f32.mrf.mxu1 }
 0x109   : > { %4026 = vst [vmem:[#allocation3_spill] sm:$0xff] %v3791_v23  ;;  %v3794_v27 = vadd.f32 %v879_v22, %v666_v12  ;;  %v3796_v28 = vpop.f32.mrf.mxu0  ;;  %v1122_v23 = vadd.f32 %v2998_v24, %v3763_v26 }
 0x10a   : > { %v1042_v14 = vpop.f32.mrf.mxu1 }
 0x10b   : > { %4027 = vst [vmem:[#allocation4_spill] sm:$0xff] %v3794_v27  ;;  %v3798_v16 = vpop.f32.mrf.mxu0  ;;  %v1121_v19 = vadd.f32 %v1042_v14, %v3765_v30 }
 0x10c   : > { %v3001_v29 = vpop.f32.mrf.mxu1 }
 0x10d   : > { %v3800_v32 = vpop.f32.mrf.mxu0  ;;  %v1351_v26 = vadd.f32 %v3796_v28, %v1121_v19 }
 0x10e   : > { %v1052_v31 = vpop.f32.mrf.mxu1 }
 0x10f   : > { %v3802_v33 = vpop.f32.mrf.mxu0  ;;  %v1123_v24 = vadd.f32 %v1052_v31, %v3769_v38 }
 0x110   : > { %v3004_v18 = vpop.f32.mrf.mxu1 }
 0x111   : > { %v3806_v36 = vpop.f32.mrf.mxu0  ;;  %v1126_v30 = vadd.f32 %v3004_v18, %v3771_v42  ;;  %v1353_v38 = vadd.f32 %v3800_v32, %v1123_v24 }
 0x112   : > { %v3804_v35 = vpop.f32.mrf.mxu1 }
 0x113   : > { %v3810_v37 = vpop.f32.mrf.mxu0  ;;  %v1356_v28 = vadd.f32 %v3802_v33, %v1126_v30  ;;  %v3917_v33 = vld [vmem:[%s4023_s2] ss:$0 sm:$0xff] }
 0x114   : > { %v3808_v20 = vpop.f32.mrf.mxu1 }
 0x115   : > { %v3814_v40 = vpop.f32.mrf.mxu0  ;;  %v1128_v31 = vadd.f32 %v3808_v20, %v3775_v50 }
 0x116   : > { %v3812_v39 = vpop.f32.mrf.mxu1 }
 0x117   : > { %v3818_v43 = vpop.f32.mrf.mxu0  ;;  %v1127_v32 = vadd.f32 %v3812_v39, %v3777_v54 }
 0x118   : > { %v3816_v41 = vpop.f32.mrf.mxu1 }
 0x119   : > { %v3822_v45 = vpop.f32.mrf.mxu0 }
 0x11a   : > { %v3820_v44 = vpop.f32.mrf.mxu1 }
 0x11b   : > { %v3826_v48 = vpop.f32.mrf.mxu0 }
 0x11c   : > { %v3824_v47 = vpop.f32.mrf.mxu1 }
 0x11d   : > { %v3830_v51 = vpop.f32.mrf.mxu0 }
 0x11e   : > { %v3828_v49 = vpop.f32.mrf.mxu1  ;;  %4028 = vst [vmem:[#allocation5_spill] sm:$0xff] %v3830_v51 }
 0x11f   : > { %v3834_v53 = vpop.f32.mrf.mxu0 }
 0x120   : > { %v3832_v52 = vpop.f32.mrf.mxu1  ;;  %4029 = vst [vmem:[#allocation6_spill] sm:$0xff] %v3834_v53 }
 0x121   : > { %v3838_v56 = vpop.f32.mrf.mxu0 }
 0x122   : > { %v3836_v55 = vpop.f32.mrf.mxu1  ;;  %4031 = vst [vmem:[#allocation8_spill] sm:$0xff] %v3838_v56 }
 0x123   : > { %4030 = vst [vmem:[#allocation7_spill] sm:$0xff] %v3836_v55  ;;  %v3842_v59 = vpop.f32.mrf.mxu0 }
 0x124   : > { %v3840_v57 = vpop.f32.mrf.mxu1  ;;  %4033 = vst [vmem:[#allocation10_spill] sm:$0xff] %v3842_v59 }
 0x125   : > { %4032 = vst [vmem:[#allocation9_spill] sm:$0xff] %v3840_v57  ;;  %v3846_v61 = vpop.f32.mrf.mxu0 }
 0x126   : > { %v3844_v60 = vpop.f32.mrf.mxu1  ;;  %4035 = vst [vmem:[#allocation12_spill] sm:$0xff] %v3846_v61 }
 0x127   : > { %4034 = vst [vmem:[#allocation11_spill] sm:$0xff] %v3844_v60  ;;  %v3076_v0 = vpop.f32.mrf.mxu0 }
 0x128   : > { %v3050_v63 = vpop.f32.mrf.mxu1 }
 0x129   : > { %v1735_v3 = vpop.f32.mrf.mxu0 }
 0x12a   : > { %v1502_v1 = vpop.f32.mrf.mxu1 }
 0x12b   : > { %v3079_v5 = vpop.f32.mrf.mxu0 }
 0x12c   : > { %v3053_v4 = vpop.f32.mrf.mxu1 }
 0x12d   : > { %v3848_v9 = vpop.f32.mrf.mxu0 }
 0x12e   : > { %v1512_v6 = vpop.f32.mrf.mxu1 }
 0x12f   : > { %v3850_v8 = vpop.f32.mrf.mxu0 }
 0x130   : > { %v3056_v11 = vpop.f32.mrf.mxu1 }
 0x131   : > { %v3852_v17 = vpop.f32.mrf.mxu0 }
 0x132   : > { %v1522_v15 = vpop.f32.mrf.mxu1 }
 0x133   : > { %v3856_v21 = vpop.f32.mrf.mxu0 }
 0x134   : > { %v3854_v10 = vpop.f32.mrf.mxu1 }
 0x135   : > { %v3860_v12 = vpop.f32.mrf.mxu0 }
 0x136   : > { %v3858_v22 = vpop.f32.mrf.mxu1 }
 0x137   : > { %v3864_v59 = vpop.f32.mrf.mxu0 }
 0x138   : > { %v3862_v61 = vpop.f32.mrf.mxu1  ;;  %4036 = vst [vmem:[#allocation13_spill] sm:$0xff] %v3864_v59 }
 0x139   : > { %v3868_v27 = vpop.f32.mrf.mxu0 }
 0x13a   : > { %v3866_v60 = vpop.f32.mrf.mxu1  ;;  %4038 = vst [vmem:[#allocation15_spill] sm:$0xff] %v3868_v27  ;;  %v1352_v27 = vadd.f32 %v3024_v25, %v1122_v23  ;;  %v1581_v25 = vadd.f32 %v1502_v1, %v1351_v26 }
 0x13b   : > { %4037 = vst [vmem:[#allocation14_spill] sm:$0xff] %v3866_v60  ;;  %v3873_v57 = vpop.f32.mrf.mxu0  ;;  %v1124_v60 = vadd.f32 %v3001_v29, %v3767_v34  ;;  %v1125_v34 = vadd.f32 %v3804_v35, %v3773_v46  ;;  %v1583_v46 = vadd.f32 %v1512_v6, %v1353_v38 }
 0x13c   : > { %v3871_v56 = vpop.f32.mrf.mxu1  ;;  %4040 = vst [vmem:[#allocation17_spill] sm:$0xff] %v3873_v57 }
 0x13d   : > { %4039 = vst [vmem:[#allocation16_spill] sm:$0xff] %v3871_v56  ;;  %v3878_v55 = vpop.f32.mrf.mxu0  ;;  %v1354_v23 = vadd.f32 %v3798_v16, %v1124_v60  ;;  %v1814_v60 = vadd.f32 %v1735_v3, %v1581_v25  ;;  %v1358_v3 = vadd.f32 %v3810_v37, %v1128_v31  ;;  %v1816_v39 = vadd.f32 %v3848_v9, %v1583_v46 }
 0x13e   : > { %v3876_v53 = vpop.f32.mrf.mxu1  ;;  %4041 = vst [vmem:[#allocation18_spill] sm:$0xff] %v3878_v55  ;;  %v1582_v55 = vadd.f32 %v3050_v63, %v1352_v27  ;;  %v1355_v63 = vadd.f32 %v3806_v36, %v1125_v34  ;;  %v1130_v36 = vadd.f32 %v3816_v41, %v3779_v58 }
 0x13f   : > { %v3883_v59 = vpop.f32.mrf.mxu0  ;;  %v1584_v42 = vadd.f32 %v3053_v4, %v1354_v23  ;;  %v1357_v23 = vadd.f32 %v3814_v40, %v1127_v32  ;;  %v1588_v37 = vadd.f32 %v3854_v10, %v1358_v3 }
 0x140   : > { %v3881_v51 = vpop.f32.mrf.mxu1  ;;  %v1815_v27 = vadd.f32 %v3076_v0, %v1582_v55  ;;  %v1586_v55 = vadd.f32 %v3056_v11, %v1356_v28  ;;  %v1585_v6 = vadd.f32 %v1522_v15, %v1355_v63  ;;  %v1360_v38 = vadd.f32 %v3818_v43, %v1130_v36  ;;  %v4045_v36 = vld [vmem:[#allocation2_spill] sm:$0xff] }
 0x141   : > { %4042 = vst [vmem:[#allocation19_spill] sm:$0xff] %v3881_v51  ;;  %v3888_v57 = vpop.f32.mrf.mxu0  ;;  %v1817_v0 = vadd.f32 %v3079_v5, %v1584_v42  ;;  %v1129_v5 = vadd.f32 %v3820_v44, %v3781_v62  ;;  %v1132_v62 = vadd.f32 %v3824_v47, %v3783_v2  ;;  %v1131_v43 = vadd.f32 %v3828_v49, %v3785_v7 }
 0x142   : > { %v3886_v56 = vpop.f32.mrf.mxu1  ;;  %v1819_v25 = vadd.f32 %v3850_v8, %v1586_v55  ;;  %v1818_v44 = vadd.f32 %v3852_v17, %v1585_v6  ;;  %v1587_v8 = vadd.f32 %v3858_v22, %v1357_v23  ;;  %v1821_v2 = vadd.f32 %v3856_v21, %v1588_v37  ;;  %v4043_v49 = vld [vmem:[#allocation14_spill] sm:$0xff]  ;;  %v4050_v37 = vld [vmem:[#allocation3_spill] sm:$0xff] }
 0x143   : > { %v3895_v51 = vpop.f32.mrf.mxu0  ;;  %v1590_v47 = vadd.f32 %v3862_v61, %v1360_v38  ;;  %v1362_v32 = vadd.f32 %v3826_v48, %v1132_v62  ;;  %v4046_v48 = vld [vmem:[#allocation7_spill] sm:$0xff] }
 0x144   : > { %v3893_v14 = vpop.f32.mrf.mxu1  ;;  %v1820_v7 = vadd.f32 %v3860_v12, %v1587_v8  ;;  %v1133_v6 = vadd.f32 %v4046_v48, %v4045_v36 }
 0x145   : > { %v3903_v19 = vpop.f32.mrf.mxu0 }
 0x146   : > { %v3901_v29 = vpop.f32.mrf.mxu1 }
 0x147   : > { %v3128_v18 = vpop.f32.mrf.mxu0 }
 0x148   : > { %v3102_v16 = vpop.f32.mrf.mxu1 }
 0x149   : > { %v2045_v35 = vadd.f32 %v3102_v16, %v1815_v27  ;;  %v2195_v20 = vpop.f32.mrf.mxu0 }
 0x14a   : > { %v1965_v50 = vpop.f32.mrf.mxu1 }
 0x14b   : > { %v2275_v1 = vadd.f32 %v3128_v18, %v2045_v35  ;;  %v2044_v4 = vadd.f32 %v1965_v50, %v1814_v60  ;;  %v3131_v54 = vpop.f32.mrf.mxu0  ;;  %v1359_v18 = vadd.f32 %v3822_v45, %v1129_v5  ;;  %v1134_v45 = vadd.f32 %v3832_v52, %v3787_v13  ;;  %v4048_v52 = vld [vmem:[#allocation16_spill] sm:$0xff]  ;;  %v4049_v5 = vld [vmem:[#allocation6_spill] sm:$0xff] }
 0x14c   : > { %v3105_v26 = vpop.f32.mrf.mxu1  ;;  %v1592_v12 = vadd.f32 %v4048_v52, %v1362_v32 }
 0x14d   : > { %v2298_v11 = vadd.f32 %v3917_v33, %v2275_v1  ;;  %v2274_v24 = vadd.f32 %v2195_v20, %v2044_v4  ;;  %v2047_v30 = vadd.f32 %v3105_v26, %v1817_v0  ;;  %v2205_v41 = vpop.f32.mrf.mxu0  ;;  %v1589_v21 = vadd.f32 %v4043_v49, %v1359_v18  ;;  %v4044_v4 = vld [vmem:[#allocation5_spill] sm:$0xff] }
 0x14e   : > { %v1975_v58 = vpop.f32.mrf.mxu1  ;;  %v1361_v3 = vadd.f32 %v4044_v4, %v1131_v43  ;;  %v4047_v26 = vld [vmem:[#allocation13_spill] sm:$0xff] }
 0x14f   : > { %v2314_v9 = vmax.f32 %v2298_v11, 0.0  ;;  %v2297_v15 = vadd.f32 %v3917_v33, %v2274_v24  ;;  %v2277_v34 = vadd.f32 %v3131_v54, %v2047_v30  ;;  %v2046_v40 = vadd.f32 %v1975_v58, %v1816_v39  ;;  %v3134_v27 = vpop.f32.mrf.mxu0  ;;  %v4051_v58 = vld [vmem:[#allocation9_spill] sm:$0xff] }
 0x150   : > { %v3108_v10 = vpop.f32.mrf.mxu1  ;;  %v1823_v13 = vadd.f32 %v4047_v26, %v1590_v47  ;;  %v4056_v18 = vld [vmem:[#allocation17_spill] sm:$0xff] }
 0x151   : > { %2330 = vst [vmem:[%s3933_s30 + $0x8] sm:$0xff] %v2314_v9  ;;  %v2313_v42 = vmax.f32 %v2297_v15, 0.0  ;;  %v2300_v28 = vadd.f32 %v3917_v33, %v2277_v34  ;;  %v2276_v31 = vadd.f32 %v2205_v41, %v2046_v40  ;;  %v2049_v16 = vadd.f32 %v3108_v10, %v1819_v25  ;;  %v2215_v22 = vpop.f32.mrf.mxu0  ;;  %v4052_v9 = vld [vmem:[#allocation15_spill] sm:$0xff] }
 0x152   : > { %v1985_v17 = vpop.f32.mrf.mxu1  ;;  %v1364_v25 = vadd.f32 %v4049_v5, %v1134_v45  ;;  %v1136_v41 = vadd.f32 %v4051_v58, %v4050_v37  ;;  %v1822_v15 = vadd.f32 %v4052_v9, %v1589_v21  ;;  %v1591_v34 = vadd.f32 %v3876_v53, %v1361_v3  ;;  %v4059_v45 = vld [vmem:[#allocation18_spill] sm:$0xff] }
 0x153   : > { %2329 = vst [vmem:[%s3933_s30] sm:$0xff] %v2313_v42  ;;  %v2316_v60 = vmax.f32 %v2300_v28, 0.0  ;;  %v2299_v46 = vadd.f32 %v3917_v33, %v2276_v31  ;;  %v2279_v35 = vadd.f32 %v3134_v27, %v2049_v16  ;;  %v2048_v63 = vadd.f32 %v1985_v17, %v1818_v44  ;;  %v3137_v61 = vpop.f32.mrf.mxu0  ;;  %v4053_v27 = vld [vmem:[#allocation8_spill] sm:$0xff]  ;;  %v4055_v31 = vld [vmem:[#allocation11_spill] sm:$0xff] }
 0x154   : > { %v3111_v55 = vpop.f32.mrf.mxu1  ;;  %v1363_v42 = vadd.f32 %v4053_v27, %v1133_v6  ;;  %v4054_v28 = vld [vmem:[#allocation4_spill] sm:$0xff]  ;;  %v1825_v43 = vadd.f32 %v4056_v18, %v1592_v12 }
 0x155   : > { %2332 = vst [vmem:[%s3933_s30 + $0x18] sm:$0xff] %v2316_v60  ;;  %v2315_v50 = vmax.f32 %v2299_v46, 0.0  ;;  %v2302_v20 = vadd.f32 %v3917_v33, %v2279_v35  ;;  %v2278_v0 = vadd.f32 %v2215_v22, %v2048_v63  ;;  %v2051_v1 = vadd.f32 %v3111_v55, %v1821_v2  ;;  %v2225_v39 = vpop.f32.mrf.mxu0  ;;  %v4057_v2 = vld [vmem:[#allocation19_spill] sm:$0xff]  ;;  %v4058_v63 = vld [vmem:[#allocation10_spill] sm:$0xff] }
 0x156   : > { %v1995_v54 = vpop.f32.mrf.mxu1  ;;  %v1135_v16 = vadd.f32 %v4055_v31, %v4054_v28  ;;  %v1594_v47 = vadd.f32 %v4057_v2, %v1364_v25  ;;  %v1366_v32 = vadd.f32 %v4058_v63, %v1136_v41  ;;  %v1593_v49 = vadd.f32 %v3886_v56, %v1363_v42 }
 0x157   : > { %2331 = vst [vmem:[%s3933_s30 + $0x10] sm:$0xff] %v2315_v50  ;;  %v2318_v11 = vmax.f32 %v2302_v20, 0.0  ;;  %v2301_v24 = vadd.f32 %v3917_v33, %v2278_v0  ;;  %v2281_v30 = vadd.f32 %v3137_v61, %v2051_v1  ;;  %v2050_v23 = vadd.f32 %v1995_v54, %v1820_v7  ;;  %v3140_v38 = vpop.f32.mrf.mxu0  ;;  %v4060_v1 = vld [vmem:[#allocation12_spill] sm:$0xff] }
 0x158   : > { %v3114_v40 = vpop.f32.mrf.mxu1  ;;  %v1824_v7 = vadd.f32 %v4059_v45, %v1591_v34  ;;  %v1365_v4 = vadd.f32 %v4060_v1, %v1135_v16  ;;  %v1827_v3 = vadd.f32 %v3883_v59, %v1594_v47  ;;  %v1596_v36 = vadd.f32 %v3893_v14, %v1366_v32 }
 0x159   : > { %2334 = vst [vmem:[%s3933_s30 + $0x28] sm:$0xff] %v2318_v11  ;;  %v2317_v62 = vmax.f32 %v2301_v24, 0.0  ;;  %v2304_v44 = vadd.f32 %v3917_v33, %v2281_v30  ;;  %v2280_v8 = vadd.f32 %v2225_v39, %v2050_v23  ;;  %v2053_v10 = vadd.f32 %v3114_v40, %v1823_v13  ;;  %v2235_v53 = vpop.f32.mrf.mxu0 }
 0x15a   : > { %v2005_v17 = vpop.f32.mrf.mxu1  ;;  %v1826_v12 = vadd.f32 %v3888_v57, %v1593_v49  ;;  %v1595_v54 = vadd.f32 %v3901_v29, %v1365_v4  ;;  %v1829_v23 = vadd.f32 %v3895_v51, %v1596_v36 }
 0x15b   : > { %2333 = vst [vmem:[%s3933_s30 + $0x20] sm:$0xff] %v2317_v62  ;;  %v2320_v22 = vmax.f32 %v2304_v44, 0.0  ;;  %v2303_v60 = vadd.f32 %v3917_v33, %v2280_v8  ;;  %v2283_v46 = vadd.f32 %v3140_v38, %v2053_v10  ;;  %v2052_v35 = vadd.f32 %v2005_v17, %v1822_v15  ;;  %v3143_v55 = vpop.f32.mrf.mxu0 }
 0x15c   : > { %v3117_v21 = vpop.f32.mrf.mxu1  ;;  %v1828_v41 = vadd.f32 %v3903_v19, %v1595_v54 }
 0x15d   : > { %2336 = vst [vmem:[%s3933_s30 + $0x38] sm:$0xff] %v2320_v22  ;;  %v2319_v61 = vmax.f32 %v2303_v60, 0.0  ;;  %v2306_v50 = vadd.f32 %v3917_v33, %v2283_v46  ;;  %v2282_v20 = vadd.f32 %v2235_v53, %v2052_v35  ;;  %v2055_v0 = vadd.f32 %v3117_v21, %v1825_v43  ;;  %v2245_v6 = vpop.f32.mrf.mxu0 }
 0x15e   : > { %v2015_v48 = vpop.f32.mrf.mxu1 }
 0x15f   : > { %2335 = vst [vmem:[%s3933_s30 + $0x30] sm:$0xff] %v2319_v61  ;;  %v2322_v26 = vmax.f32 %v2306_v50, 0.0  ;;  %v2305_v56 = vadd.f32 %v3917_v33, %v2282_v20  ;;  %v2285_v13 = vadd.f32 %v3143_v55, %v2055_v0  ;;  %v2054_v52 = vadd.f32 %v2015_v48, %v1824_v7  ;;  %v3146_v11 = vpop.f32.mrf.mxu0 }
 0x160   : > { %v3120_v39 = vpop.f32.mrf.mxu1 }
 0x161   : > { %2338 = vst [vmem:[%s3933_s30 + $0x48] sm:$0xff] %v2322_v26  ;;  %v2321_v59 = vmax.f32 %v2305_v56, 0.0  ;;  %v2308_v14 = vadd.f32 %v3917_v33, %v2285_v13  ;;  %v2284_v24 = vadd.f32 %v2245_v6, %v2054_v52  ;;  %v2057_v30 = vadd.f32 %v3120_v39, %v1827_v3  ;;  %v2255_v25 = vpop.f32.mrf.mxu0 }
 0x162   : > { %v2025_v5 = vpop.f32.mrf.mxu1 }
 0x163   : > { %2337 = vst [vmem:[%s3933_s30 + $0x40] sm:$0xff] %v2321_v59  ;;  %v2324_v37 = vmax.f32 %v2308_v14, 0.0  ;;  %v2307_v57 = vadd.f32 %v3917_v33, %v2284_v24  ;;  %v2287_v58 = vadd.f32 %v3146_v11, %v2057_v30  ;;  %v2056_v29 = vadd.f32 %v2025_v5, %v1826_v12  ;;  %v3149_v15 = vpop.f32.mrf.mxu0 }
 0x164   : > { %v3123_v9 = vpop.f32.mrf.mxu1 }
 0x165   : > { %2340 = vst [vmem:[%s3933_s30 + $0x58] sm:$0xff] %v2324_v37  ;;  %v2323_v34 = vmax.f32 %v2307_v57, 0.0  ;;  %v2310_v40 = vadd.f32 %v3917_v33, %v2287_v58  ;;  %v2286_v51 = vadd.f32 %v2255_v25, %v2056_v29  ;;  %v2059_v38 = vadd.f32 %v3123_v9, %v1829_v23  ;;  %v2265_v42 = vpop.f32.mrf.mxu0 }
 0x166   : > { %v2035_v62 = vpop.f32.mrf.mxu1 }
 0x167   : > { %2339 = vst [vmem:[%s3933_s30 + $0x50] sm:$0xff] %v2323_v34  ;;  %v2326_v44 = vmax.f32 %v2310_v40, 0.0  ;;  %v2309_v8 = vadd.f32 %v3917_v33, %v2286_v51  ;;  %v2289_v10 = vadd.f32 %v3149_v15, %v2059_v38  ;;  %v2058_v27 = vadd.f32 %v2035_v62, %v1828_v41 }
 0x169   : > { %2342 = vst [vmem:[%s3933_s30 + $0x68] sm:$0xff] %v2326_v44  ;;  %v2325_v19 = vmax.f32 %v2309_v8, 0.0  ;;  %v2312_v28 = vadd.f32 %v3917_v33, %v2289_v10  ;;  %v2288_v31 = vadd.f32 %v2265_v42, %v2058_v27 }
 0x16b   : > { %2341 = vst [vmem:[%s3933_s30 + $0x60] sm:$0xff] %v2325_v19  ;;  %v2328_v16 = vmax.f32 %v2312_v28, 0.0  ;;  %v2311_v18 = vadd.f32 %v3917_v33, %v2288_v31 }
 0x16d   : > { %2344 = vst [vmem:[%s3933_s30 + $0x78] sm:$0xff] %v2328_v16  ;;  %v2327_v43 = vmax.f32 %v2311_v18, 0.0 }
 0x16f   : > { %2343 = vst [vmem:[%s3933_s30 + $0x70] sm:$0xff] %v2327_v43 }
 0x170 PF: > { %s13_s16 = sadd.s32 1, %s3231_s16   ;;  %s4061_s12 = smov %s3223_s14 }
 0x171   : > { %p10_p7 = scmp.ge.s32.totalorder %s13_s16, 6   ;;  %s4062_s13 = smov %s3227_s15 }
 0x172   : > { %s4063_s14 = smov %s4066_s17  ;;  %s4064_s15 = smov %s4070_s18 }
 0x173   :  { %12 = sbr.rel (!%p10_p7) target bundleno = 3 (0x3), region = 79 }

</bundles_post_ra>
